<compile_context>
chip_gen: v7x
topology: tpu7x:2x2x1
jax: 0.10.0
libtpu: 0.0.40
codegen_flags: <defaults>
</compile_context>

<pallas_src>
import functools

import jax
import jax.numpy as jnp
from jax.experimental import pallas as pl
from jax.experimental.pallas import tpu as pltpu


_VALID_ABLATIONS = ("none", "randomly_sampled", "zero_ablate",
                    "random_ablate", "complement_sampled")

# ~4 MiB per input block: amortizes the ~0.35 us per-grid-step overhead (on
# v7x's 3.2 TB/s HBM a 2 MiB block is only ~1.3 us of DMA) while keeping the
# fused double-buffered working set at ~2*(4+4) = 16 MiB, inside the explicit
# 32 MiB scoped-VMEM limit (v5e's default is only 16 MiB, hence explicit) and
# v7x's 64 MiB physical VMEM.
_TARGET_BLOCK_BYTES = 4 * 1024 * 1024
_MAX_LANE_TILE = 2048
_VMEM_LIMIT_BYTES = 32 * 1024 * 1024
# Below this element count a dedicated pallas_call is pure launch/pipeline
# overhead; XLA fuses the compare+sum into one pass for such sizes anyway.
_SMALL_FALLBACK_SIZE = 64 * 1024


def _round_up(x, m):
    return ((x + m - 1) // m) * m


def _round_down(x, m):
    return (x // m) * m


def _sublane_multiple(dtype):
    # f32 -> 8, bf16/f16 -> 16, int8/fp8 -> 32 (packed sublanes).
    return max(8, 32 // jnp.dtype(dtype).itemsize)


def _check_ablation(ablation):
    if ablation not in _VALID_ABLATIONS:
        raise ValueError(
            "Only none, randomly_sampled, zero_ablate, random_ablate, and "
            "complement_sampled are supported")
    if ablation in ("randomly_sampled", "complement_sampled"):
        # TODO(synk): sampling-based ablations are defined by subclasses, not MaskLayer.
        raise NotImplementedError(ablation)
    return ablation in ("zero_ablate", "random_ablate")   # invert flag


def _as_2d(params):
    """Free (layout-preserving) reshape to a 2-D view suitable for tiling."""
    if params.ndim == 1:
        n = params.shape[0]
        for w in (_MAX_LANE_TILE, 1024, 512, 256, 128):
            if n % w == 0:
                return params.reshape(n // w, w)
        return params.reshape(1, n)
    if params.ndim == 2:
        return params
    return params.reshape(-1, params.shape[-1])


def _choose_tiles(R, C, param_dtype, mask_dtype=None):
    """Pick (row_tile, col_tile, grid_rows, grid_cols); no wrapper padding."""
    sub = _sublane_multiple(param_dtype)
    if mask_dtype is not None:
        sub = max(sub, _sublane_multiple(mask_dtype))
    itemsize = jnp.dtype(param_dtype).itemsize
    # Lane tile: full C when small (block dim == array dim is always legal);
    # otherwise a 128-multiple cap -- partial last column block handled by the
    # in-kernel tail mask.  Keeps blocks bounded for 1-D / very wide params.
    tc = C if C <= _MAX_LANE_TILE else _MAX_LANE_TILE
    bytes_per_row = itemsize * tc
    tr = _round_down(max(_TARGET_BLOCK_BYTES // bytes_per_row, sub), sub)
    tr = max(sub, min(tr, _round_up(R, sub)))
    gr, gc = pl.cdiv(R, tr), pl.cdiv(C, tc)
    # v7x megacore: a (1,1) grid leaves one TensorCore idle; split rows.
    if gr * gc == 1 and R > sub:
        tr = _round_up(pl.cdiv(R, 2), sub)
        gr = pl.cdiv(R, tr)
    return tr, tc, gr, gc


def _mask_jax(params2d, invert, mask_dtype):
    pos = params2d > 0
    if invert:
        pos = jnp.logical_not(pos)
    return pos.astype(mask_dtype), jnp.count_nonzero(pos).astype(jnp.float32)


# ----------------------------------------------------------------------------
# Kernels
# ----------------------------------------------------------------------------
def _valid_count(pos, R, C, tr, tc, need_row_mask, need_col_mask):
    """Exact int32 count of True entries of `pos` that lie inside the array."""
    valid = pos
    if need_row_mask:
        rows = (jax.lax.broadcasted_iota(jnp.int32, (tr, tc), 0)
                + pl.program_id(0) * tr)
        valid = jnp.logical_and(valid, rows < R)
    if need_col_mask:
        cols = (jax.lax.broadcasted_iota(jnp.int32, (tr, tc), 1)
                + pl.program_id(1) * tc)
        valid = jnp.logical_and(valid, cols < C)
    return jnp.sum(valid.astype(jnp.int32)).reshape(1, 1)


def _fused_mask_l0_kernel(invert, mask_dtype, R, C, tr, tc,
                          need_row_mask, need_col_mask,
                          p_ref, mask_ref, partial_ref):
    """One (tr, tc) block: write binary mask + this block's int32 partial L0."""
    p = p_ref[...]                       # native dtype (f32 / bf16 / ...)
    pos = p > jnp.zeros((), dtype=p.dtype)
    if invert:                           # zero_ablate / random_ablate
        pos = jnp.logical_not(pos)
    # Out-of-range positions of the last partial blocks are discarded by Pallas
    # on the store, so no masking is needed for the mask write itself.
    mask_ref[...] = pos.astype(mask_dtype)
    partial_ref[...] = _valid_count(pos, R, C, tr, tc,
                                    need_row_mask, need_col_mask)


def _l0_only_kernel(invert, R, C, tr, tc, need_row_mask, need_col_mask,
                    p_ref, partial_ref):
    """L0-only variant: no mask write -> roughly half the HBM traffic."""
    p = p_ref[...]
    pos = p > jnp.zeros((), dtype=p.dtype)
    if invert:
        pos = jnp.logical_not(pos)
    partial_ref[...] = _valid_count(pos, R, C, tr, tc,
                                    need_row_mask, need_col_mask)


# ----------------------------------------------------------------------------
# pallas_call wrappers
# ----------------------------------------------------------------------------
def _run_fused(params2d, invert, mask_dtype):
    R, C = params2d.shape
    tr, tc, gr, gc = _choose_tiles(R, C, params2d.dtype, mask_dtype)
    need_row = (R % tr) != 0
    need_col = (C % tc) != 0

    mask, partials = pl.pallas_call(
        functools.partial(_fused_mask_l0_kernel, invert, mask_dtype,
                          R, C, tr, tc, need_row, need_col),
        out_shape=(
            jax.ShapeDtypeStruct((R, C), mask_dtype),
            jax.ShapeDtypeStruct((gr, gc, 1, 1), jnp.int32),
        ),
        grid_spec=pltpu.PrefetchScalarGridSpec(
            num_scalar_prefetch=0,
            grid=(gr, gc),
            in_specs=[pl.BlockSpec((tr, tc), lambda i, j: (i, j))],
            out_specs=(
                pl.BlockSpec((tr, tc), lambda i, j: (i, j)),
                # Per-block partial sums (unique block per grid point) keep
                # both axes "parallel" for megacore sharding.
                pl.BlockSpec((None, None, 1, 1), lambda i, j: (i, j, 0, 0)),
            ),
        ),
        compiler_params=pltpu.CompilerParams(
            dimension_semantics=("parallel", "parallel"),
            vmem_limit_bytes=_VMEM_LIMIT_BYTES),
    )(params2d)

    return mask, jnp.sum(partials).astype(jnp.float32)


def _run_l0_only(params2d, invert):
    R, C = params2d.shape
    tr, tc, gr, gc = _choose_tiles(R, C, params2d.dtype)
    need_row = (R % tr) != 0
    need_col = (C % tc) != 0

    partials = pl.pallas_call(
        functools.partial(_l0_only_kernel, invert,
                          R, C, tr, tc, need_row, need_col),
        out_shape=jax.ShapeDtypeStruct((gr, gc, 1, 1), jnp.int32),
        grid_spec=pltpu.PrefetchScalarGridSpec(
            num_scalar_prefetch=0,
            grid=(gr, gc),
            in_specs=[pl.BlockSpec((tr, tc), lambda i, j: (i, j))],
            out_specs=pl.BlockSpec((None, None, 1, 1),
                                   lambda i, j: (i, j, 0, 0)),
        ),
        compiler_params=pltpu.CompilerParams(
            dimension_semantics=("parallel", "parallel"),
            vmem_limit_bytes=_VMEM_LIMIT_BYTES),
    )(params2d)

    return jnp.sum(partials).astype(jnp.float32)


@functools.partial(jax.jit, static_argnames=("ablation", "mask_dtype"))
def mask_and_l0(params, *, ablation="none", mask_dtype=None):
    """Fused binary mask + L0 for one mask-parameter tensor (native dtype)."""
    invert = _check_ablation(ablation)
    if mask_dtype is None:
        mask_dtype = params.dtype          # bf16 params -> bf16 mask (less BW)
    orig_shape = params.shape
    p2 = _as_2d(params)
    if params.size < _SMALL_FALLBACK_SIZE:
        m, l0 = _mask_jax(p2, invert, mask_dtype)
        return m.reshape(orig_shape), l0
    mask, l0 = _run_fused(p2, invert, mask_dtype)
    return mask.reshape(orig_shape), l0


@functools.partial(jax.jit, static_argnames=("ablation",))
def l0_only(params, *, ablation="none"):
    """L0 of the binary mask without materializing the mask in HBM."""
    invert = _check_ablation(ablation)
    p2 = _as_2d(params)
    if params.size < _SMALL_FALLBACK_SIZE:
        return _mask_jax(p2, invert, jnp.float32)[1]
    return _run_l0_only(p2, invert)


# ----------------------------------------------------------------------------
# MaskLayer counterpart
# ----------------------------------------------------------------------------
class MaskLayerPallas:
    """JAX/Pallas counterpart of NeuroSurgeon's MaskLayer (concrete mask/L0 path)."""

    def __init__(self, ablation: str, mask_unit: str, mask_bias: bool,
                 weight_mask_params: jnp.ndarray,
                 bias_mask_params: jnp.ndarray | None = None):
        if ablation not in _VALID_ABLATIONS:
            raise ValueError(
                "Only none, randomly_sampled, zero_ablate, random_ablate, and "
                "complement_sampled are supported")
        if mask_unit not in ("neuron", "weight"):
            raise ValueError("mask_unit must be 'neuron' or 'weight'")
        self.ablation = ablation
        self.mask_unit = mask_unit
        self.mask_bias = mask_bias
        self.use_masks = True
        self.training = True
        self.weight_mask_params = weight_mask_params
        self.bias_mask_params = bias_mask_params
        # param_type -> (params_obj, ablation, mask, l0); invalidated when the
        # parameter array object or ablation changes.
        self._cache = {}

    def train(self, train_bool: bool):
        self.training = train_bool

    def _params(self, param_type: str):
        if param_type == "weight_mask_params":
            return self.weight_mask_params
        if param_type == "bias_mask_params":
            return self.bias_mask_params
        raise ValueError(param_type)

    def _mask_and_l0(self, param_type: str):
        params = self._params(param_type)
        entry = self._cache.get(param_type)
        if (entry is None or entry[0] is not params
                or entry[1] != self.ablation):
            mask, l0 = mask_and_l0(params, ablation=self.ablation)
            entry = (params, self.ablation, mask, l0)
            self._cache[param_type] = entry
        return entry[2], entry[3]

    def _compute_mask(self, param_type: str):
        return self._mask_and_l0(param_type)[0]

    def _l0(self, param_type: str):
        params = self._params(param_type)
        entry = self._cache.get(param_type)
        if (entry is not None and entry[0] is params
                and entry[1] == self.ablation):
            return entry[3]                      # reuse fused result
        return l0_only(params, ablation=self.ablation)

    def calculate_l0(self):
        l0 = self._l0("weight_mask_params")
        if self.mask_bias:
            l0 = l0 + self._l0("bias_mask_params")
        return l0

    def calculate_max_l0(self):
        max_l0 = self.weight_mask_params.size
        if self.mask_bias:
            max_l0 += self.bias_mask_params.size
        return max_l0


if __name__ == "__main__":
    key = jax.random.PRNGKey(0)
    k_w, k_b, k_wide, k_bf, k_flat, k_new = jax.random.split(key, 6)

    # --- (1) Linear-layer-style masks; row count is NOT a tile multiple -> the
    # fused and L0-only kernels exercise the in-kernel row-tail masking path.
    out_features, in_features = 321, 384
    w_params = jax.random.normal(k_w, (out_features, in_features), jnp.float32)
    b_params = jax.random.normal(k_b, (1, out_features), jnp.float32)  # small path

    layer = MaskLayerPallas(
        ablation="none", mask_unit="weight", mask_bias=True,
        weight_mask_params=w_params, bias_mask_params=b_params)

    l0 = layer.calculate_l0()                       # L0-only kernel (no mask write)
    w_mask = layer._compute_mask("weight_mask_params")   # fused kernel
    b_mask = layer._compute_mask("bias_mask_params")     # small fallback
    jax.block_until_ready((l0, w_mask, b_mask))

    ref_w = (w_params > 0).astype(jnp.float32)
    ref_b = (b_params > 0).astype(jnp.float32)
    assert jnp.array_equal(w_mask, ref_w)
    assert jnp.array_equal(b_mask, ref_b)
    assert jnp.allclose(l0, ref_w.sum() + ref_b.sum())
    assert layer.calculate_max_l0() == out_features * in_features + out_features

    # Cache invalidation: replacing the parameter array must recompute.
    new_w = jax.random.normal(k_new, (out_features, in_features), jnp.float32)
    layer.weight_mask_params = new_w
    l0_new = layer.calculate_l0()
    assert jnp.allclose(
        l0_new, (new_w > 0).sum().astype(jnp.float32) + ref_b.sum())

    # --- (2) zero_ablate (inverted mask), wide non-128-divisible columns ->
    # exercises lane tiling with in-kernel column-tail masking.
    wide = jax.random.normal(k_wide, (40, 3000), jnp.float32)
    layer_inv = MaskLayerPallas(
        ablation="zero_ablate", mask_unit="weight", mask_bias=False,
        weight_mask_params=wide)
    l0_inv = layer_inv.calculate_l0()
    inv_mask = layer_inv._compute_mask("weight_mask_params")
    jax.block_until_ready((l0_inv, inv_mask))
    ref_inv = 1.0 - (wide > 0).astype(jnp.float32)
    assert jnp.array_equal(inv_mask, ref_inv)
    assert jnp.allclose(l0_inv, ref_inv.sum())

    # --- (3) bf16 mask params: read natively (no upfront f32 cast), bf16 mask out.
    bf = jax.random.normal(k_bf, (out_features, in_features), jnp.float32
                           ).astype(jnp.bfloat16)
    m_bf, l0_bf = mask_and_l0(bf, ablation="none")
    jax.block_until_ready((m_bf, l0_bf))
    ref_bf = (bf > 0).astype(jnp.bfloat16)
    assert m_bf.dtype == jnp.bfloat16
    assert jnp.array_equal(m_bf, ref_bf)
    assert jnp.allclose(l0_bf, jnp.count_nonzero(bf > 0).astype(jnp.float32))

    # --- (4) flat 1-D params (128-divisible) -> reshaped to lane-dense 2-D.
    flat = jax.random.normal(k_flat, (70016,), jnp.float32)
    m_flat, l0_flat = mask_and_l0(flat, ablation="none")
    l0_flat_only = l0_only(flat, ablation="none")
    jax.block_until_ready((m_flat, l0_flat, l0_flat_only))
    ref_flat = (flat > 0).astype(jnp.float32)
    assert m_flat.shape == flat.shape
    assert jnp.array_equal(m_flat, ref_flat)
    assert jnp.allclose(l0_flat, ref_flat.sum())
    assert jnp.allclose(l0_flat_only, ref_flat.sum())

    print("KERNEL_OK")
</pallas_src>

<mosaic_0001>
module attributes {stable_mosaic.version = 11 : i64} {
  func.func @_l0_only_kernel(%arg0: i32, %arg1: i32, %arg2: memref<168x384xf32, #tpu.memory_space<vmem>>, %arg3: memref<1x1x1x1xi32, #tpu.memory_space<vmem>>) attributes {dimension_semantics = [#tpu.dimension_semantics<parallel>, #tpu.dimension_semantics<parallel>], iteration_bounds = array<i64: 2, 1>, scalar_prefetch = 0 : i64, scratch_operands = 0 : i64, tpu.core_type = #tpu.core_type<tc>, window_params = [{transform_indices = @transform_0, window_bounds = array<i64: 168, 384>}, {transform_indices = @transform_1, window_bounds = array<i64: 1, 1, 1, 1>}]} {
    %c0 = arith.constant 0 : index
    %c0_0 = arith.constant 0 : index
    %0 = vector.load %arg2[%c0, %c0_0] : memref<168x384xf32, #tpu.memory_space<vmem>>, vector<168x384xf32>
    %cst = arith.constant 0.000000e+00 : f32
    %1 = vector.broadcast %cst : f32 to vector<168x384xf32>
    %2 = arith.cmpf ogt, %0, %1 : vector<168x384xf32>
    %3 = tpu.iota {dimensions = array<i32: 0>} : vector<168x384xi32>
    %c168_i32 = arith.constant 168 : i32
    %4 = arith.muli %arg0, %c168_i32 : i32
    %5 = vector.broadcast %4 : i32 to vector<168x384xi32>
    %6 = arith.addi %3, %5 : vector<168x384xi32>
    %c321_i32 = arith.constant 321 : i32
    %7 = vector.broadcast %c321_i32 : i32 to vector<168x384xi32>
    %8 = arith.cmpi slt, %6, %7 : vector<168x384xi32>
    %9 = arith.andi %2, %8 : vector<168x384xi1>
    %10 = arith.extui %9 : vector<168x384xi1> to vector<168x384xi32>
    %11 = vector.shape_cast %10 : vector<168x384xi32> to vector<1x168x384xi32>
    %cst_1 = arith.constant dense<0> : vector<1xi32>
    %12 = vector.multi_reduction <add>, %11, %cst_1 [1, 2] : vector<1x168x384xi32> to vector<1xi32>
    %13 = vector.shape_cast %12 : vector<1xi32> to vector<1x1x1xi32>
    %14 = vector.extract %13[0, 0, 0] : i32 from vector<1x1x1xi32>
    %15 = vector.broadcast %14 : i32 to vector<1x1xi32>
    %c0_2 = arith.constant 0 : index
    %c0_3 = arith.constant 0 : index
    %c0_4 = arith.constant 0 : index
    %c0_5 = arith.constant 0 : index
    %16 = vector.load %arg3[%c0_2, %c0_3, %c0_4, %c0_5] : memref<1x1x1x1xi32, #tpu.memory_space<vmem>>, vector<1x1x1x1xi32>
    %17 = vector.shape_cast %16 : vector<1x1x1x1xi32> to vector<1x1xi32>
    %18 = vector.shape_cast %15 : vector<1x1xi32> to vector<1x1x1x1xi32>
    tpu.vector_store %arg3[%c0_2, %c0_3, %c0_4, %c0_5], %18 {strides = array<i32>} : memref<1x1x1x1xi32, #tpu.memory_space<vmem>>, vector<1x1x1x1xi32>,
    return
  }
  func.func @transform_0(%arg0: i32, %arg1: i32) -> (i32, i32) {
    %c0_i32 = arith.constant 0 : i32
    return %arg0, %arg1 : i32, i32
  }
  func.func @transform_1(%arg0: i32, %arg1: i32) -> (i32, i32, i32, i32) {
    %c0_i32 = arith.constant 0 : i32
    %c0_i32_0 = arith.constant 0 : i32
    %c0_i32_1 = arith.constant 0 : i32
    return %arg0, %arg1, %c0_i32, %c0_i32_0 : i32, i32, i32, i32
  }
}

</mosaic_0001>

<bundles_post_ra>
// kernel: l0_only.1
= control target key start
LH: loop header
LB: loop body
LE: loop exit
PB: predicated region body
PF: predicated region fallthrough
CT: control target
= control target key end

     0   :  { %6 = vsyncpa [#allocation3], 0  ;;  %s1253_s0 = inlined_call_operand.hbm [shape: f32[321,384], index: 0, kind: input, shape index: {}]   ;;  %s1254_s1 = inlined_call_operand.vmem [shape: s32[2,1,1,1], index: 1, kind: output, shape index: {}]  }
   0x1   :  { %8 = vsyncpa [#allocation3 + $0x1], 0  ;;  %s818_s6 = smov 0   ;;  %s820_s7 = smov 0  }
   0x2   :  { %s822_s8 = smov 0   ;;  %s824_s9 = smov 0  }
   0x3   :  { %s826_s10 = smov 0   ;;  %s828_s11 = smov 0  }
   0x4 LB: > { %s654_s12 = sadd.s32 4294967295, %s802_s11   ;;  %s26_s13 = sadd.s32 1, %s798_s10  ;;  %s802_s11 = sphi %s828_s11, %s14_s11   ;;  %s798_s10 = sphi %s826_s10, %s1268_s10   ;;  %s794_s9 = sphi %s824_s9, %s1267_s9   ;;  %s790_s8 = sphi %s822_s8, %s1266_s8   ;;  %s786_s7 = sphi %s820_s7, %s1265_s7   ;;  %s782_s6 = sphi %s818_s6, %s1264_s6  }
   0x5   : > { %p28_p0 = scmp.ge.s32.totalorder %s26_s13, 2  ;;  %s35_s14 = sadd.s32 1, %s790_s8 }
   0x6   : > { %p42_p1 = scmp.ne.s32.totalorder %s790_s8, %s786_s7  ;;  %p43_p2 = scmp.eq.s32.totalorder %s802_s11, 0 }
   0x7   : > { %s1270_s13 = smov (%p28_p0, %s26_s13), 0  ;;  %p48_p4 = scmp.ne.s32.totalorder %s786_s7, %s782_s6 }
   0x8   : > { %p44_p3 = por %p43_p2, %p42_p1  ;;  %s30_s15 = ssub.s32 %s798_s10, %s1270_s13 }
   0x9   : > { %p49_p5 = scmp.eq.s32.totalorder %s654_s12, 0  ;;  %p33_p6 = scmp.eq.s32.totalorder %s30_s15, 0 }
   0xa   : > { %p657_p8 = scmp.ge.s32.totalorder %s802_s11, 2 }
   0xb   : > { %p857_p7 = por %p49_p5, %p48_p4 }
   0xc   : > { %s862_s17 = scalar_select %p33_p6, %s790_s8, %s35_s14  }
   0xd   : > { %96 = sbr.rel (%p657_p8) target bundleno = 56 (0x38), region = 16 }
  0x14   : > { %99 = sbr.rel (!%p44_p3) target bundleno = 56 (0x38), region = 20  ;;  %s100_s18 = sand.u32 (%p44_p3), 1, %s790_s8  }
  0x15   : > { %s105_s19 = smul.u32 (%p44_p3), 21, %s798_s10  ;;  %s870_s24 = scalar_lea.sflag (%p44_p3), [#allocation3], %s100_s18 }
  0x16   : > { %s666_s20 = smul.u32 (%p44_p3), 504, %s100_s18 }
  0x17   : > { %s107_s21 = ssub.s32 (%p44_p3), 41, %s105_s19 }
  0x18   : > { %p108_p9 = scmp.lt.s32.totalorder (%p44_p3), %s107_s21, 21  ;;  %s104_s25 = scalar_lea.vmem (%p44_p3), [#allocation2], %s666_s20 }
  0x1b   : > { %s1272_s21 = smov (!%p108_p9, %s107_s21), 21 }
  0x1c   : > { %s867_s22 = smul.u32 384, %s1272_s21 }
  0x1e   : > { %s113_s23 = ssub.s32 8064, %s867_s22 }
  0x1f   : > { %114 = vsyncadd %s870_s24, %s113_s23  ;;  %p660_p10 = scmp.ne.s32.totalorder %s867_s22, 0  ;;  %s672_s26 = smul.u32 8064, %s798_s10 }
  0x20   : > { %s121_s27 = sshll.u32 %s104_s25, 4  ;;  %s728_s5 = scalar_lea.hbm %s1253_s0, 15744  ;;  %s880_s27 = int_to_ptr.vmem [resolvable:$true] %s121_s27 }
  0x21   : > { %s878_s30 = scalar_lea.hbm %s1253_s0, %s672_s26 }
  0x22   : > { %s724_s2 = scalar_lea.hbm %s878_s30, %s867_s22  ;;  %p729_p0 = scmp.lt.u32.totalorder %s878_s30, %s1253_s0 }
  0x23   : > { %p725_p11 = scmp.ne.s32.totalorder %s878_s30, %s724_s2  ;;  %p730_p1 = scmp.lt.u32.totalorder %s728_s5, %s724_s2 }
  0x24   : > { %p732_p3 = scmp.lt.u32.totalorder %s724_s2, %s878_s30 }
  0x25   : > { %p726_p12 = pnand %p725_p11, %p660_p10  ;;  %p731_p2 = por %p730_p1, %p729_p0 }
  0x27   : > { %p727_p13 = pneg %p726_p12  ;;  %p733_p4 = por %p732_p3, %p731_p2 }
  0x29   : > { %p734_p5 = pnand %p733_p4, %p727_p13 }
  0x2b   : > { %737 = shalt.err (!%p734_p5)
}
  0x2c   : > { %s738_s14 = scalar_lea.vmem %s880_s27, %s867_s22  ;;  %s804_s15 = smov [#allocation2]  }
  0x2d   : > { %p739_p6 = scmp.ne.s32.totalorder %s880_s27, %s738_s14  ;;  %s742_s18 = sshll.u32 %s804_s15, 4  ;;  %s743_s18 = int_to_ptr.vmem [resolvable:$false] %s742_s18 }
  0x2e   : > { %s744_s19 = scalar_lea.vmem %s743_s18, 16128  ;;  %p745_p11 = scmp.lt.s32.totalorder %s880_s27, %s743_s18 }
  0x2f   : > { %p740_p8 = pnand %p739_p6, %p660_p10  ;;  %p746_p12 = scmp.lt.s32.totalorder %s744_s19, %s738_s14 }
  0x31   : > { %p741_p9 = pneg %p740_p8  ;;  %p747_p0 = por %p746_p12, %p745_p11 }
  0x33   : > { %p748_p1 = pnand %p747_p0, %p741_p9 }
  0x35   : > { %751 = shalt.err (!%p748_p1)
}
  0x36   : > { %s805_s20 = smov 384   ;;  %s806_s21 = smov 24  }
  0x37   : > { %127 = dma.hbm_to_vmem [thread:$0]  (%p660_p10), %s878_s30, %s867_s22, %s880_s27, %s870_s24, %s805_s20, %s805_s20, %s806_s21  }
  0x38 PF: > { %p663_p13 = scmp.ge.s32.totalorder %s802_s11, 1  ;;  %p129_p2 = scmp.lt.s32.totalorder %s802_s11, 3 }
  0x3a   : > { %p130_p3 = pnand %p663_p13, %p129_p2 }
  0x3b   : > { %s135_s23 = sand.u32 (!%p130_p3), 1, %s786_s7  }
  0x3c   : > { %133 = sbr.rel (%p130_p3) target bundleno = 363 (0x16b), region = 24  ;;  %s136_s26 = scalar_lea.sflag (!%p130_p3), [#allocation3], %s135_s23 }
  0x3d   : > { %s668_s25 = smul.u32 (!%p130_p3), 504, %s135_s23 }
  0x3f   : > { %s910_s28 = scalar_lea.vmem (!%p130_p3), [#allocation2], %s668_s25 }
  0x43   : > { %777 = dma.done.wait (%p857_p7), %s136_s26, 8064  }
  0x44   : > { %779 = vsyncadd (%p857_p7), %s136_s26, 4294959232  ;;  %v298_v0 = vlaneseq  ;;  %s320_s22 = smul.u32 168, %s794_s9  ;;  %v172_v4 = vld [vmem:[%s910_s28] sm:$0xff]  ;;  %v173_v5 = vld [vmem:[%s910_s28 + $0x8] sm:$0xff]  ;;  %v807_v30 = vmov 0   ;;  %p166_p7 = scmp.lt.s32.totalorder %s794_s9, 1 }
  0x45   : > { %v174_v8 = vld [vmem:[%s910_s28 + $0x10] sm:$0xff]  ;;  %v175_v9 = vld [vmem:[%s910_s28 + $0x18] sm:$0xff]  ;;  %vm235_vm0 = vcmp.gt.f32.partialorder %v172_v4, 0.0  ;;  %v176_v11 = vld [vmem:[%s910_s28 + $0x20] sm:$0xff]  ;;  %vm236_vm1 = vcmp.gt.f32.partialorder %v173_v5, 0.0 }
  0x46   : > { %v917_v1 = vshrl.u32 %v298_v0, 7  ;;  %v919_v2 = vstv %s320_s22  ;;  %v177_v13 = vld [vmem:[%s910_s28 + $0x28] sm:$0xff]  ;;  %vm237_vm2 = vcmp.gt.f32.partialorder %v174_v8, 0.0  ;;  %v178_v15 = vld [vmem:[%s910_s28 + $0x30] sm:$0xff]  ;;  %v179_v16 = vld [vmem:[%s910_s28 + $0x38] sm:$0xff]  ;;  %vm238_vm4 = vcmp.gt.f32.partialorder %v175_v9, 0.0 }
  0x47   : > { %v180_v18 = vld [vmem:[%s910_s28 + $0x40] sm:$0xff]  ;;  %v181_v19 = vld [vmem:[%s910_s28 + $0x48] sm:$0xff]  ;;  %vm239_vm6 = vcmp.gt.f32.partialorder %v176_v11, 0.0  ;;  %v182_v22 = vld [vmem:[%s910_s28 + $0x50] sm:$0xff]  ;;  %vm240_vm9 = vcmp.gt.f32.partialorder %v177_v13, 0.0  ;;  %vm241_vm11 = vcmp.gt.f32.partialorder %v178_v15, 0.0 }
  0x48   : > { %v300_v3 = vadd.s32 8, %v917_v1  ;;  %v301_v6 = vadd.s32 16, %v917_v1  ;;  %v322_v7 = vadd.s32 %v919_v2, %v917_v1  ;;  %v302_v12 = vadd.s32 24, %v917_v1  ;;  %v183_v28 = vld [vmem:[%s910_s28 + $0x58] sm:$0xff]  ;;  %v184_v33 = vld [vmem:[%s910_s28 + $0x60] sm:$0xff]  ;;  %v185_v37 = vld [vmem:[%s910_s28 + $0x68] sm:$0xff] }
  0x49   : > { %v303_v20 = vadd.s32 32, %v917_v1  ;;  %v304_v25 = vadd.s32 40, %v917_v1  ;;  %vm242_vm14 = vcmp.gt.f32.partialorder %v179_v16, 0.0  ;;  %vm243_vm15 = vcmp.gt.f32.partialorder %v180_v18, 0.0  ;;  %v186_v42 = vld [vmem:[%s910_s28 + $0x70] sm:$0xff]  ;;  %v187_v46 = vld [vmem:[%s910_s28 + $0x78] sm:$0xff] }
  0x4a   : > { %v323_v10 = vadd.s32 %v919_v2, %v300_v3  ;;  %v324_v14 = vadd.s32 %v919_v2, %v301_v6  ;;  %vm343_vm3 = vcmp.lt.s32.totalorder %v322_v7, 321  ;;  %v325_v23 = vadd.s32 %v919_v2, %v302_v12  ;;  %v188_v49 = vld [vmem:[%s910_s28 + $0x80] sm:$0xff]  ;;  %v189_v50 = vld [vmem:[%s910_s28 + $0x88] sm:$0xff]  ;;  %v190_v57 = vld [vmem:[%s910_s28 + $0x90] sm:$0xff]  ;;  %s1274_s9 = smov (!%p166_p7, %s794_s9), 1 }
  0x4b   : > { %vm936_vm5 = vmand %vm235_vm0, %vm343_vm3  ;;  %vm244_vm0 = vcmp.gt.f32.partialorder %v181_v19, 0.0  ;;  %v305_v27 = vadd.s32 48, %v917_v1  ;;  %v326_v29 = vadd.s32 %v919_v2, %v303_v20  ;;  %v327_v43 = vadd.s32 %v919_v2, %v304_v25  ;;  %v191_v60 = vld [vmem:[%s910_s28 + $0x98] sm:$0xff]  ;;  %v192_v63 = vld [vmem:[%s910_s28 + $0xa0] sm:$0xff]  ;;  %s171_s27 = scalar_lea.vmem %s1254_s1, %s1274_s9 }
  0x4c   : > { %vm344_vm7 = vcmp.lt.s32.totalorder %v323_v10, 321  ;;  %vm944_vm8 = vmand %vm236_vm1, %vm343_vm3  ;;  %vm345_vm12 = vcmp.lt.s32.totalorder %v324_v14, 321  ;;  %v427_v31 = vsel %vm936_vm5, 1, %v807_v30  ;;  %v306_v47 = vadd.s32 56, %v917_v1  ;;  %v193_v0 = vld [vmem:[%s910_s28 + $0xa8] sm:$0xff]  ;;  %v194_v9 = vld [vmem:[%s910_s28 + $0xb0] sm:$0xff] }
  0x4d   : > { %vm951_vm10 = vmand %vm237_vm2, %vm343_vm3  ;;  %vm245_vm2 = vcmp.gt.f32.partialorder %v182_v22, 0.0  ;;  %v428_v32 = vsel %vm944_vm8, 1, %v807_v30  ;;  %v328_v54 = vadd.s32 %v919_v2, %v305_v27  ;;  %v307_v61 = vadd.s32 64, %v917_v1  ;;  %v195_v13 = vld [vmem:[%s910_s28 + $0xb8] sm:$0xff]  ;;  %v196_v16 = vld [vmem:[%s910_s28 + $0xc0] sm:$0xff] }
  0x4e   : > { %vm958_vm13 = vmand %vm238_vm4, %vm344_vm7  ;;  %vm346_vm4 = vcmp.lt.s32.totalorder %v325_v23, 321  ;;  %v429_v34 = vsel %vm951_vm10, 1, %v807_v30  ;;  %vm347_vm10 = vcmp.lt.s32.totalorder %v326_v29, 321  ;;  %v329_v3 = vadd.s32 %v919_v2, %v306_v47  ;;  %v197_v20 = vld [vmem:[%s910_s28 + $0xc8] sm:$0xff]  ;;  %v198_v24 = vld [vmem:[%s910_s28 + $0xd0] sm:$0xff] }
  0x4f   : > { %vm368_vm1 = vmand %vm239_vm6, %vm344_vm7  ;;  %v430_v38 = vsel %vm958_vm13, 1, %v807_v30  ;;  %vm248_vm13 = vcmp.gt.f32.partialorder %v185_v37, 0.0  ;;  %v308_v10 = vadd.s32 72, %v917_v1  ;;  %v330_v14 = vadd.s32 %v919_v2, %v307_v61  ;;  %v205_v47 = vld [vmem:[%s910_s28 + $0x108] sm:$0xff]  ;;  %v208_v61 = vld [vmem:[%s910_s28 + $0x120] sm:$0xff] }
  0x50   : > { %vm369_vm3 = vmand %vm240_vm9, %vm344_vm7  ;;  %v431_v35 = vsel %vm368_vm1, 1, %v807_v30  ;;  %vm246_vm7 = vcmp.gt.f32.partialorder %v183_v28, 0.0  ;;  %vm247_vm9 = vcmp.gt.f32.partialorder %v184_v33, 0.0  ;;  %vm348_vm1 = vcmp.lt.s32.totalorder %v327_v43, 321  ;;  %v199_v28 = vld [vmem:[%s910_s28 + $0xd8] sm:$0xff]  ;;  %v201_v33 = vld [vmem:[%s910_s28 + $0xe8] sm:$0xff] }
  0x51   : > { %vm370_vm6 = vmand %vm241_vm11, %vm345_vm12  ;;  %v432_v36 = vsel %vm369_vm3, 1, %v807_v30  ;;  %v490_v40 = vadd.s32 %v431_v35, %v427_v31  ;;  %vm251_vm3 = vcmp.gt.f32.partialorder %v188_v49, 0.0  ;;  %v309_v21 = vadd.s32 80, %v917_v1  ;;  %v203_v43 = vld [vmem:[%s910_s28 + $0xf8] sm:$0xff] }
  0x52   : > { %vm371_vm5 = vmand %vm242_vm14, %vm345_vm12  ;;  %v433_v39 = vsel %vm370_vm6, 1, %v807_v30  ;;  %v491_v41 = vadd.s32 %v432_v36, %v428_v32  ;;  %vm249_vm14 = vcmp.gt.f32.partialorder %v186_v42, 0.0  ;;  %vm252_vm6 = vcmp.gt.f32.partialorder %v189_v50, 0.0  ;;  %v200_v32 = vld [vmem:[%s910_s28 + $0xe0] sm:$0xff] }
  0x53   : > { %vm372_vm8 = vmand %vm243_vm15, %vm345_vm12  ;;  %v434_v44 = vsel %vm371_vm5, 1, %v807_v30  ;;  %v492_v45 = vadd.s32 %v433_v39, %v429_v34  ;;  %v331_v25 = vadd.s32 %v919_v2, %v308_v10  ;;  %v310_v29 = vadd.s32 88, %v917_v1 }
  0x54   : > { %vm373_vm11 = vmand %vm244_vm0, %vm346_vm4  ;;  %v435_v48 = vsel %vm372_vm8, 1, %v807_v30  ;;  %v493_v52 = vadd.s32 %v434_v44, %v430_v38  ;;  %vm250_vm0 = vcmp.gt.f32.partialorder %v187_v46, 0.0  ;;  %vm349_vm8 = vcmp.lt.s32.totalorder %v328_v54, 321  ;;  %v204_v46 = vld [vmem:[%s910_s28 + $0x100] sm:$0xff]  ;;  %v206_v54 = vld [vmem:[%s910_s28 + $0x110] sm:$0xff] }
  0x55   : > { %vm374_vm12 = vmand %vm245_vm2, %vm346_vm4  ;;  %v436_v51 = vsel %vm373_vm11, 1, %v807_v30  ;;  %v494_v53 = vadd.s32 %v490_v40, %v435_v48  ;;  %vm254_vm11 = vcmp.gt.f32.partialorder %v191_v60, 0.0  ;;  %v332_v37 = vadd.s32 %v919_v2, %v309_v21  ;;  %v202_v40 = vld [vmem:[%s910_s28 + $0xf0] sm:$0xff] }
  0x56   : > { %vm375_vm15 = vmand %vm246_vm7, %vm346_vm4  ;;  %v437_v55 = vsel %vm374_vm12, 1, %v807_v30  ;;  %v495_v56 = vadd.s32 %v491_v41, %v436_v51  ;;  %vm253_vm7 = vcmp.gt.f32.partialorder %v190_v57, 0.0  ;;  %vm256_vm12 = vcmp.gt.f32.partialorder %v193_v0, 0.0 }
  0x57   : > { %vm376_vm2 = vmand %vm247_vm9, %vm347_vm10  ;;  %v438_v58 = vsel %vm375_vm15, 1, %v807_v30  ;;  %v496_v59 = vadd.s32 %v492_v45, %v437_v55  ;;  %vm350_vm15 = vcmp.lt.s32.totalorder %v329_v3, 321  ;;  %v311_v44 = vadd.s32 96, %v917_v1  ;;  %v209_v3 = vld [vmem:[%s910_s28 + $0x128] sm:$0xff] }
  0x58   : > { %vm377_vm4 = vmand %vm248_vm13, %vm347_vm10  ;;  %v439_v62 = vsel %vm376_vm2, 1, %v807_v30  ;;  %v497_v5 = vadd.s32 %v493_v52, %v438_v58  ;;  %vm255_vm13 = vcmp.gt.f32.partialorder %v192_v63, 0.0  ;;  %vm257_vm2 = vcmp.gt.f32.partialorder %v194_v9, 0.0  ;;  %v207_v58 = vld [vmem:[%s910_s28 + $0x118] sm:$0xff] }
  0x59   : > { %vm378_vm5 = vmand %vm249_vm14, %vm347_vm10  ;;  %v440_v4 = vsel %vm377_vm4, 1, %v807_v30  ;;  %v498_v6 = vadd.s32 %v494_v53, %v439_v62  ;;  %vm259_vm4 = vcmp.gt.f32.partialorder %v196_v16, 0.0  ;;  %v333_v48 = vadd.s32 %v919_v2, %v310_v29  ;;  %v217_v29 = vld [vmem:[%s910_s28 + $0x168] sm:$0xff] }
  0x5a   : > { %vm379_vm9 = vmand %vm250_vm0, %vm348_vm1  ;;  %v441_v7 = vsel %vm378_vm5, 1, %v807_v30  ;;  %v499_v8 = vadd.s32 %v495_v56, %v440_v4  ;;  %vm351_vm5 = vcmp.lt.s32.totalorder %v330_v14, 321  ;;  %v312_v55 = vadd.s32 104, %v917_v1  ;;  %v212_v14 = vld [vmem:[%s910_s28 + $0x140] sm:$0xff] }
  0x5b   : > { %vm380_vm10 = vmand %vm251_vm3, %vm348_vm1  ;;  %v442_v11 = vsel %vm379_vm9, 1, %v807_v30  ;;  %v500_v12 = vadd.s32 %v496_v59, %v441_v7  ;;  %vm258_vm3 = vcmp.gt.f32.partialorder %v195_v13, 0.0  ;;  %vm260_vm9 = vcmp.gt.f32.partialorder %v197_v20, 0.0  ;;  %v210_v7 = vld [vmem:[%s910_s28 + $0x130] sm:$0xff] }
  0x5c   : > { %vm381_vm14 = vmand %vm252_vm6, %vm348_vm1  ;;  %v443_v15 = vsel %vm380_vm10, 1, %v807_v30  ;;  %v501_v18 = vadd.s32 %v497_v5, %v442_v11  ;;  %v334_v59 = vadd.s32 %v919_v2, %v311_v44  ;;  %v313_v4 = vadd.s32 112, %v917_v1  ;;  %v211_v11 = vld [vmem:[%s910_s28 + $0x138] sm:$0xff]  ;;  %v220_v44 = vld [vmem:[%s910_s28 + $0x180] sm:$0xff] }
  0x5d   : > { %vm382_vm0 = vmand %vm253_vm7, %vm349_vm8  ;;  %v444_v17 = vsel %vm381_vm14, 1, %v807_v30  ;;  %v502_v19 = vadd.s32 %v498_v6, %v443_v15  ;;  %v213_v15 = vld [vmem:[%s910_s28 + $0x148] sm:$0xff] }
  0x5e   : > { %vm383_vm1 = vmand %vm254_vm11, %vm349_vm8  ;;  %v445_v22 = vsel %vm382_vm0, 1, %v807_v30  ;;  %v503_v23 = vadd.s32 %v499_v8, %v444_v17  ;;  %vm261_vm11 = vcmp.gt.f32.partialorder %v198_v24, 0.0  ;;  %vm263_vm0 = vcmp.gt.f32.partialorder %v200_v32, 0.0 }
  0x5f   : > { %vm384_vm6 = vmand %vm255_vm13, %vm349_vm8  ;;  %v446_v26 = vsel %vm383_vm1, 1, %v807_v30  ;;  %v504_v27 = vadd.s32 %v500_v12, %v445_v22  ;;  %vm262_vm13 = vcmp.gt.f32.partialorder %v199_v28, 0.0  ;;  %v335_v8 = vadd.s32 %v919_v2, %v312_v55  ;;  %v214_v22 = vld [vmem:[%s910_s28 + $0x150] sm:$0xff]  ;;  %v216_v28 = vld [vmem:[%s910_s28 + $0x160] sm:$0xff] }
  0x60   : > { %vm385_vm7 = vmand %vm256_vm12, %vm350_vm15  ;;  %v447_v31 = vsel %vm384_vm6, 1, %v807_v30  ;;  %v505_v35 = vadd.s32 %v501_v18, %v446_v26  ;;  %vm352_vm12 = vcmp.lt.s32.totalorder %v331_v25, 321  ;;  %vm353_vm6 = vcmp.lt.s32.totalorder %v332_v37, 321  ;;  %v215_v25 = vld [vmem:[%s910_s28 + $0x158] sm:$0xff]  ;;  %v218_v37 = vld [vmem:[%s910_s28 + $0x170] sm:$0xff] }
  0x61   : > { %vm386_vm8 = vmand %vm257_vm2, %vm350_vm15  ;;  %v448_v34 = vsel %vm385_vm7, 1, %v807_v30  ;;  %v506_v36 = vadd.s32 %v502_v19, %v447_v31  ;;  %vm264_vm2 = vcmp.gt.f32.partialorder %v201_v33, 0.0  ;;  %vm266_vm7 = vcmp.gt.f32.partialorder %v203_v43, 0.0 }
  0x62   : > { %vm387_vm10 = vmand %vm258_vm3, %vm350_vm15  ;;  %v449_v38 = vsel %vm386_vm8, 1, %v807_v30  ;;  %v507_v39 = vadd.s32 %v503_v23, %v448_v34  ;;  %vm265_vm3 = vcmp.gt.f32.partialorder %v202_v40, 0.0  ;;  %vm268_vm8 = vcmp.gt.f32.partialorder %v205_v47, 0.0 }
  0x63   : > { %vm388_vm14 = vmand %vm259_vm4, %vm351_vm5  ;;  %v450_v41 = vsel %vm387_vm10, 1, %v807_v30  ;;  %v508_v42 = vadd.s32 %v504_v27, %v449_v38  ;;  %vm354_vm10 = vcmp.lt.s32.totalorder %v333_v48, 321  ;;  %v314_v12 = vadd.s32 120, %v917_v1 }
  0x64   : > { %vm389_vm15 = vmand %vm260_vm9, %vm351_vm5  ;;  %v451_v45 = vsel %vm388_vm14, 1, %v807_v30  ;;  %v509_v50 = vadd.s32 %v505_v35, %v450_v41  ;;  %vm267_vm9 = vcmp.gt.f32.partialorder %v204_v46, 0.0  ;;  %vm269_vm14 = vcmp.gt.f32.partialorder %v206_v54, 0.0  ;;  %v219_v41 = vld [vmem:[%s910_s28 + $0x178] sm:$0xff] }
  0x65   : > { %vm390_vm1 = vmand %vm261_vm11, %vm351_vm5  ;;  %v452_v49 = vsel %vm389_vm15, 1, %v807_v30  ;;  %v510_v51 = vadd.s32 %v506_v36, %v451_v45  ;;  %vm271_vm15 = vcmp.gt.f32.partialorder %v208_v61, 0.0  ;;  %v336_v19 = vadd.s32 %v919_v2, %v313_v4  ;;  %v221_v45 = vld [vmem:[%s910_s28 + $0x188] sm:$0xff] }
  0x66   : > { %vm391_vm4 = vmand %vm262_vm13, %vm352_vm12  ;;  %v453_v52 = vsel %vm390_vm1, 1, %v807_v30  ;;  %v511_v53 = vadd.s32 %v507_v39, %v452_v49  ;;  %vm355_vm1 = vcmp.lt.s32.totalorder %v334_v59, 321  ;;  %v315_v26 = vadd.s32 128, %v917_v1  ;;  %v225_v59 = vld [vmem:[%s910_s28 + $0x1a8] sm:$0xff] }
  0x67   : > { %vm392_vm5 = vmand %vm263_vm0, %vm352_vm12  ;;  %v454_v56 = vsel %vm391_vm4, 1, %v807_v30  ;;  %v512_v57 = vadd.s32 %v508_v42, %v453_v52  ;;  %vm270_vm0 = vcmp.gt.f32.partialorder %v207_v58, 0.0  ;;  %vm272_vm4 = vcmp.gt.f32.partialorder %v209_v3, 0.0  ;;  %v222_v52 = vld [vmem:[%s910_s28 + $0x190] sm:$0xff]  ;;  %v224_v58 = vld [vmem:[%s910_s28 + $0x1a0] sm:$0xff] }
  0x68   : > { %vm393_vm11 = vmand %vm264_vm2, %vm352_vm12  ;;  %v455_v60 = vsel %vm392_vm5, 1, %v807_v30  ;;  %v513_v63 = vadd.s32 %v509_v50, %v454_v56  ;;  %v337_v31 = vadd.s32 %v919_v2, %v314_v12  ;;  %v316_v38 = vadd.s32 136, %v917_v1  ;;  %v223_v56 = vld [vmem:[%s910_s28 + $0x198] sm:$0xff]  ;;  %v229_v12 = vld [vmem:[%s910_s28 + $0x1c8] sm:$0xff] }
  0x69   : > { %vm394_vm13 = vmand %vm265_vm3, %vm353_vm6  ;;  %v456_v62 = vsel %vm393_vm11, 1, %v807_v30  ;;  %v514_v0 = vadd.s32 %v510_v51, %v455_v60  ;;  %v338_v42 = vadd.s32 %v919_v2, %v315_v26  ;;  %v317_v49 = vadd.s32 144, %v917_v1 }
  0x6a   : > { %vm395_vm12 = vmand %vm266_vm7, %vm353_vm6  ;;  %v457_v5 = vsel %vm394_vm13, 1, %v807_v30  ;;  %v515_v6 = vadd.s32 %v511_v53, %v456_v62  ;;  %vm273_vm7 = vcmp.gt.f32.partialorder %v210_v7, 0.0  ;;  %vm275_vm13 = vcmp.gt.f32.partialorder %v212_v14, 0.0 }
  0x6b   : > { %vm396_vm2 = vmand %vm267_vm9, %vm353_vm6  ;;  %v458_v9 = vsel %vm395_vm12, 1, %v807_v30  ;;  %v516_v10 = vadd.s32 %v512_v57, %v457_v5  ;;  %vm274_vm9 = vcmp.gt.f32.partialorder %v211_v11, 0.0  ;;  %v339_v53 = vadd.s32 %v919_v2, %v316_v38  ;;  %v226_v5 = vld [vmem:[%s910_s28 + $0x1b0] sm:$0xff]  ;;  %v228_v11 = vld [vmem:[%s910_s28 + $0x1c0] sm:$0xff] }
  0x6c   : > { %vm397_vm3 = vmand %vm268_vm8, %vm354_vm10  ;;  %v459_v13 = vsel %vm396_vm2, 1, %v807_v30  ;;  %v517_v17 = vadd.s32 %v513_v63, %v458_v9  ;;  %vm356_vm8 = vcmp.lt.s32.totalorder %v335_v8, 321  ;;  %vm357_vm2 = vcmp.lt.s32.totalorder %v336_v19, 321  ;;  %v227_v8 = vld [vmem:[%s910_s28 + $0x1b8] sm:$0xff] }
  0x6d   : > { %vm398_vm6 = vmand %vm269_vm14, %vm354_vm10  ;;  %v460_v16 = vsel %vm397_vm3, 1, %v807_v30  ;;  %v518_v18 = vadd.s32 %v514_v0, %v459_v13  ;;  %vm276_vm14 = vcmp.gt.f32.partialorder %v213_v15, 0.0  ;;  %vm278_vm3 = vcmp.gt.f32.partialorder %v215_v25, 0.0 }
  0x6e   : > { %vm399_vm5 = vmand %vm270_vm0, %vm354_vm10  ;;  %v461_v20 = vsel %vm398_vm6, 1, %v807_v30  ;;  %v519_v21 = vadd.s32 %v515_v6, %v460_v16  ;;  %vm277_vm0 = vcmp.gt.f32.partialorder %v214_v22, 0.0  ;;  %vm280_vm6 = vcmp.gt.f32.partialorder %v217_v29, 0.0 }
  0x6f   : > { %vm400_vm11 = vmand %vm271_vm15, %vm355_vm1  ;;  %v462_v23 = vsel %vm399_vm5, 1, %v807_v30  ;;  %v520_v24 = vadd.s32 %v516_v10, %v461_v20  ;;  %vm358_vm5 = vcmp.lt.s32.totalorder %v337_v31, 321  ;;  %v318_v60 = vadd.s32 152, %v917_v1  ;;  %v234_v31 = vld [vmem:[%s910_s28 + $0x1f0] sm:$0xff] }
  0x70   : > { %vm401_vm10 = vmand %vm272_vm4, %vm355_vm1  ;;  %v463_v27 = vsel %vm400_vm11, 1, %v807_v30  ;;  %v521_v33 = vadd.s32 %v517_v17, %v462_v23  ;;  %vm279_vm4 = vcmp.gt.f32.partialorder %v216_v28, 0.0  ;;  %vm281_vm11 = vcmp.gt.f32.partialorder %v218_v37, 0.0  ;;  %v233_v28 = vld [vmem:[%s910_s28 + $0x1e8] sm:$0xff] }
  0x71   : > { %vm402_vm12 = vmand %vm273_vm7, %vm355_vm1  ;;  %v464_v32 = vsel %vm401_vm10, 1, %v807_v30  ;;  %v522_v34 = vadd.s32 %v518_v18, %v463_v27  ;;  %vm283_vm10 = vcmp.gt.f32.partialorder %v220_v44, 0.0  ;;  %v340_v0 = vadd.s32 %v919_v2, %v317_v49  ;;  %v230_v18 = vld [vmem:[%s910_s28 + $0x1d0] sm:$0xff] }
  0x72   : > { %vm403_vm15 = vmand %vm274_vm9, %vm356_vm8  ;;  %v465_v35 = vsel %vm402_vm12, 1, %v807_v30  ;;  %v523_v36 = vadd.s32 %v519_v21, %v464_v32  ;;  %vm284_vm12 = vcmp.gt.f32.partialorder %v221_v45, 0.0  ;;  %v319_v9 = vadd.s32 160, %v917_v1  ;;  %v231_v21 = vld [vmem:[%s910_s28 + $0x1d8] sm:$0xff] }
  0x73   : > { %vm404_vm1 = vmand %vm275_vm13, %vm356_vm8  ;;  %v466_v39 = vsel %vm403_vm15, 1, %v807_v30  ;;  %v524_v40 = vadd.s32 %v520_v24, %v465_v35  ;;  %vm282_vm13 = vcmp.gt.f32.partialorder %v219_v41, 0.0  ;;  %v341_v13 = vadd.s32 %v919_v2, %v318_v60  ;;  %v232_v24 = vld [vmem:[%s910_s28 + $0x1e0] sm:$0xff] }
  0x74   : > { %vm405_vm7 = vmand %vm276_vm14, %vm356_vm8  ;;  %v467_v43 = vsel %vm404_vm1, 1, %v807_v30  ;;  %v525_v47 = vadd.s32 %v521_v33, %v466_v39  ;;  %v342_v22 = vadd.s32 %v919_v2, %v319_v9 }
  0x75   : > { %vm406_vm9 = vmand %vm277_vm0, %vm357_vm2  ;;  %v468_v46 = vsel %vm405_vm7, 1, %v807_v30  ;;  %v526_v48 = vadd.s32 %v522_v34, %v467_v43  ;;  %vm359_vm0 = vcmp.lt.s32.totalorder %v338_v42, 321 }
  0x76   : > { %vm407_vm8 = vmand %vm278_vm3, %vm357_vm2  ;;  %v469_v50 = vsel %vm406_vm9, 1, %v807_v30  ;;  %v527_v51 = vadd.s32 %v523_v36, %v468_v46  ;;  %vm285_vm3 = vcmp.gt.f32.partialorder %v222_v52, 0.0  ;;  %vm287_vm9 = vcmp.gt.f32.partialorder %v224_v58, 0.0 }
  0x77   : > { %vm408_vm14 = vmand %vm279_vm4, %vm357_vm2  ;;  %v470_v54 = vsel %vm407_vm8, 1, %v807_v30  ;;  %v528_v55 = vadd.s32 %v524_v40, %v469_v50  ;;  %vm286_vm4 = vcmp.gt.f32.partialorder %v223_v56, 0.0 }
  0x78   : > { %vm409_vm15 = vmand %vm280_vm6, %vm358_vm5  ;;  %v471_v57 = vsel %vm408_vm14, 1, %v807_v30  ;;  %v529_v62 = vadd.s32 %v525_v47, %v470_v54  ;;  %vm360_vm6 = vcmp.lt.s32.totalorder %v339_v53, 321  ;;  %vm361_vm14 = vcmp.lt.s32.totalorder %v340_v0, 321 }
  0x79   : > { %vm410_vm2 = vmand %vm281_vm11, %vm358_vm5  ;;  %v472_v61 = vsel %vm409_vm15, 1, %v807_v30  ;;  %v530_v63 = vadd.s32 %v526_v48, %v471_v57  ;;  %vm288_vm11 = vcmp.gt.f32.partialorder %v225_v59, 0.0 }
  0x7a   : > { %vm411_vm1 = vmand %vm282_vm13, %vm358_vm5  ;;  %v473_v3 = vsel %vm410_vm2, 1, %v807_v30  ;;  %v531_v4 = vadd.s32 %v527_v51, %v472_v61  ;;  %vm289_vm13 = vcmp.gt.f32.partialorder %v226_v5, 0.0  ;;  %vm292_vm2 = vcmp.gt.f32.partialorder %v229_v12, 0.0 }
  0x7b   : > { %vm412_vm7 = vmand %vm283_vm10, %vm359_vm0  ;;  %v474_v6 = vsel %vm411_vm1, 1, %v807_v30  ;;  %v532_v7 = vadd.s32 %v528_v55, %v473_v3  ;;  %vm362_vm1 = vcmp.lt.s32.totalorder %v341_v13, 321 }
  0x7c   : > { %vm413_vm5 = vmand %vm284_vm12, %vm359_vm0  ;;  %v475_v10 = vsel %vm412_vm7, 1, %v807_v30  ;;  %v533_v15 = vadd.s32 %v529_v62, %v474_v6  ;;  %vm290_vm12 = vcmp.gt.f32.partialorder %v227_v8, 0.0  ;;  %vm293_vm7 = vcmp.gt.f32.partialorder %v230_v18, 0.0 }
  0x7d   : > { %vm414_vm8 = vmand %vm285_vm3, %vm359_vm0  ;;  %v476_v14 = vsel %vm413_vm5, 1, %v807_v30  ;;  %v534_v16 = vadd.s32 %v530_v63, %v475_v10  ;;  %vm291_vm0 = vcmp.gt.f32.partialorder %v228_v11, 0.0  ;;  %vm295_vm5 = vcmp.gt.f32.partialorder %v232_v24, 0.0 }
  0x7e   : > { %vm415_vm10 = vmand %vm286_vm4, %vm360_vm6  ;;  %v477_v1 = vsel %vm414_vm8, 1, %v807_v30  ;;  %v535_v17 = vadd.s32 %v531_v4, %v476_v14  ;;  %vm363_vm8 = vcmp.lt.s32.totalorder %v342_v22, 321 }
  0x7f   : > { %vm416_vm15 = vmand %vm287_vm9, %vm360_vm6  ;;  %v478_v19 = vsel %vm415_vm10, 1, %v807_v30  ;;  %v536_v20 = vadd.s32 %v532_v7, %v477_v1  ;;  %vm296_vm10 = vcmp.gt.f32.partialorder %v233_v28, 0.0 }
  0x80   : > { %vm417_vm3 = vmand %vm288_vm11, %vm360_vm6  ;;  %v479_v23 = vsel %vm416_vm15, 1, %v807_v30  ;;  %v537_v26 = vadd.s32 %v533_v15, %v478_v19  ;;  %vm294_vm6 = vcmp.gt.f32.partialorder %v231_v21, 0.0  ;;  %vm297_vm15 = vcmp.gt.f32.partialorder %v234_v31, 0.0 }
  0x81   : > { %vm418_vm4 = vmand %vm289_vm13, %vm361_vm14  ;;  %v480_v25 = vsel %vm417_vm3, 1, %v807_v30  ;;  %v538_v27 = vadd.s32 %v534_v16, %v479_v23 }
  0x82   : > { %vm419_vm9 = vmand %vm290_vm12, %vm361_vm14  ;;  %v481_v2 = vsel %vm418_vm4, 1, %v807_v30  ;;  %v539_v29 = vadd.s32 %v535_v17, %v480_v25 }
  0x83   : > { %vm420_vm11 = vmand %vm291_vm0, %vm361_vm14  ;;  %v482_v32 = vsel %vm419_vm9, 1, %v807_v30  ;;  %v540_v33 = vadd.s32 %v536_v20, %v481_v2 }
  0x84   : > { %vm421_vm13 = vmand %vm292_vm2, %vm362_vm1  ;;  %v483_v34 = vsel %vm420_vm11, 1, %v807_v30  ;;  %v541_v36 = vadd.s32 %v537_v26, %v482_v32 }
  0x85   : > { %vm422_vm12 = vmand %vm293_vm7, %vm362_vm1  ;;  %v484_v35 = vsel %vm421_vm13, 1, %v807_v30  ;;  %v542_v37 = vadd.s32 %v538_v27, %v483_v34 }
  0x86   : > { %vm423_vm14 = vmand %vm294_vm6, %vm362_vm1  ;;  %v485_v38 = vsel %vm422_vm12, 1, %v807_v30  ;;  %v543_v39 = vadd.s32 %v539_v29, %v484_v35  ;;  %vm572_vm1 = vcmask 0  }
  0x87   : > { %vm424_vm0 = vmand %vm295_vm5, %vm363_vm8  ;;  %v486_v40 = vsel %vm423_vm14, 1, %v807_v30  ;;  %v544_v41 = vadd.s32 %v540_v33, %v485_v38 }
  0x88   : > { %vm425_vm2 = vmand %vm296_vm10, %vm363_vm8  ;;  %v487_v42 = vsel %vm424_vm0, 1, %v807_v30  ;;  %v545_v44 = vadd.s32 %v541_v36, %v486_v40 }
  0x89   : > { %vm426_vm3 = vmand %vm297_vm15, %vm363_vm8  ;;  %v488_v43 = vsel %vm425_vm2, 1, %v807_v30  ;;  %v546_v45 = vadd.s32 %v542_v37, %v487_v42 }
  0x8a   : > { %v489_v46 = vsel %vm426_vm3, 1, %v807_v30  ;;  %v547_v47 = vadd.s32 %v543_v39, %v488_v43 }
  0x8b   : > { %v548_v48 = vadd.s32 %v544_v41, %v489_v46 }
  0x8c   : > { %v549_v49 = vadd.s32 %v547_v47, %v546_v45 }
  0x8d   : > { %v550_v50 = vadd.s32 %v548_v48, %v545_v44 }
  0x8f   : > { %v551_v51 = vadd.s32 %v550_v50, %v549_v49 }
  0x91   : > { %v553_v52 = vshrl.u32 %v551_v51, 16  ;;  %v552_v53 = vand.u32 65535, %v551_v51 }
  0x93   : > { %v555_v54 = vcvt.s32.f32 %v553_v52  ;;  %v554_v55 = vcvt.s32.f32 %v552_v53 }
  0x95   : > { %558 = vadd.xlane.f32.xlu0 %v555_v54 }
  0x99   : > { %556 = vadd.xlane.f32.xlu0 %v554_v55 }
 0x122   : > { %v559_v56 = vpop.xlane.xlu0 %558 }
 0x123   : > { %v561_v57 = vcvt.f32.s32 %v559_v56 }
 0x125   : > { %v562_v59 = vshll.u32 %v561_v57, 16 }
 0x126   : > { %v557_v58 = vpop.xlane.xlu0 %556 }
 0x127   : > { %v560_v60 = vcvt.f32.s32 %v557_v58 }
 0x129   : > { %v563_v61 = vadd.s32 %v562_v59, %v560_v60 }
 0x12b   : > { %v564_v30 = vrot.slane %v563_v61, 4 }
 0x12d   : > { %v565_v62 = vadd.s32 %v564_v30, %v563_v61 }
 0x12f   : > { %v566_v63 = vrot.slane %v565_v62, 2 }
 0x131   : > { %v567_v0 = vadd.s32 %v566_v63, %v565_v62 }
 0x133   : > { %v568_v3 = vrot.slane %v567_v0, 1 }
 0x135   : > { %v569_v4 = vadd.s32 %v568_v3, %v567_v0 }
 0x137   : > { %669 = vpush %v569_v4 }
 0x168   : > { %s670_s29 = spop %669 }
 0x169   : > { %v571_v5 = vstv %s670_s29 }
 0x16a   : > { %573 = vst.msk [vmem:[%s171_s27] sm:$0x1] %vm572_vm1, %v571_v5 }
 0x16b PF: > { %s14_s11 = sadd.s32 1, %s802_s11   ;;  %s1264_s6 = smov %s786_s7 }
 0x16c   : > { %p11_p10 = scmp.ge.s32.totalorder %s14_s11, 4   ;;  %s1265_s7 = smov %s790_s8 }
 0x16d   : > { %s1266_s8 = smov %s862_s17  ;;  %s1267_s9 = smov %s798_s10 }
 0x16e   : > { %s1268_s10 = smov %s1270_s13  ;;  %13 = sbr.rel (!%p11_p10) target bundleno = 4 (0x4), region = 64 }
 0x175   :  { %597 = vsyncpa [#allocation3], 1 }
 0x176   :  { %599 = vsyncpa [#allocation3 + $0x1], 1 }

</bundles_post_ra>
